<compile_context>
chip_gen: v7x
topology: tpu7x:2x2x1
jax: 0.10.0
libtpu: 0.0.40
codegen_flags: <defaults>
</compile_context>

<pallas_src>
import jax
import jax.numpy as jnp
from jax.experimental import pallas as pl
from jax.experimental.pallas import tpu as pltpu

# True (unpadded) layer sizes from the PyTorch module.
DIMS = [325, 250, 150, 100, 52]
# Lane-aligned (multiple-of-128) padded sizes.
PDIMS = [384, 256, 256, 128, 128]

BATCH_TILE = 256  # rows per grid step (clipped down for small batches)


def _pad_to(n, m):
    return ((n + m - 1) // m) * m


def cuore_kernel(x_ref, w1_ref, w2_ref, w3_ref, w4_ref, b_ref, o_ref):
    """Fused 4-layer MLP forward on one batch tile.

    x_ref:  (Bt, 384) activation tile (new block each grid step)
    wN_ref: padded weights, resident across the grid (constant index_map)
    b_ref:  (8, 256) packed biases; row i = layer-i bias, zero padded
    o_ref:  (Bt, 128) output tile
    """
    x = x_ref[...]
    b = b_ref[...]

    h = jnp.dot(x, w1_ref[...], preferred_element_type=jnp.float32) + b[0:1, :]
    h = jnp.maximum(h, 0.0)

    h = jnp.dot(h, w2_ref[...], preferred_element_type=jnp.float32) + b[1:2, :]
    h = jnp.maximum(h, 0.0)

    h = jnp.dot(h, w3_ref[...], preferred_element_type=jnp.float32) + b[2:3, :128]
    h = jnp.maximum(h, 0.0)

    h = jnp.dot(h, w4_ref[...], preferred_element_type=jnp.float32) + b[3:4, :128]
    h = jnp.maximum(h, 0.0)

    # + 0.0001 * ones((1, 52)) in the reference -> broadcast constant add.
    o_ref[...] = h + jnp.float32(1e-4)


def init_params(key):
    """Deterministic params matching nn.Linear default init (U[-1/sqrt(fan_in), +])."""
    params = []
    for i in range(4):
        fan_in, fan_out = DIMS[i], DIMS[i + 1]
        key, kw, kb = jax.random.split(key, 3)
        bound = 1.0 / jnp.sqrt(jnp.float32(fan_in))
        # Stored as (in, out) == W.T of the torch (out, in) weight.
        w = jax.random.uniform(kw, (fan_in, fan_out), jnp.float32, -bound, bound)
        b = jax.random.uniform(kb, (fan_out,), jnp.float32, -bound, bound)
        params.append((w, b))
    return params


def pad_params(params):
    """Zero-pad weights/biases to lane-aligned shapes ONCE (outside the jitted forward)."""
    padded_ws = []
    b_packed = jnp.zeros((8, 256), jnp.float32)
    for i, (w, b) in enumerate(params):
        wp = jnp.zeros((PDIMS[i], PDIMS[i + 1]), jnp.float32)
        wp = wp.at[:DIMS[i], :DIMS[i + 1]].set(w)
        padded_ws.append(wp)
        b_packed = b_packed.at[i, :DIMS[i + 1]].set(b)
    return tuple(padded_ws), b_packed


@jax.jit
def cuore_forward(game_state, padded_ws, b_packed):
    """game_state: (B, 325) float32 -> (B, 52) float32."""
    B = game_state.shape[0]
    Bp8 = _pad_to(max(B, 8), 8)          # batch padded to a multiple of 8
    bt = min(BATCH_TILE, Bp8)            # batch tile (multiple of 8)
    Bp = _pad_to(Bp8, bt)                # padded batch divisible by the tile
    grid = (Bp // bt,)

    # Only the activation needs per-call padding; weights were padded at init.
    x = jnp.zeros((Bp, PDIMS[0]), jnp.float32).at[:B, :DIMS[0]].set(game_state)

    w1, w2, w3, w4 = padded_ws

    flops = 2 * Bp * sum(PDIMS[i] * PDIMS[i + 1] for i in range(4))
    bytes_accessed = 4 * (Bp * PDIMS[0]
                          + sum(PDIMS[i] * PDIMS[i + 1] for i in range(4))
                          + 8 * 256
                          + Bp * PDIMS[-1])

    out_padded = pl.pallas_call(
        cuore_kernel,
        out_shape=jax.ShapeDtypeStruct((Bp, PDIMS[-1]), jnp.float32),
        grid=grid,
        in_specs=[
            # x: new batch tile each step (double-buffered by Pallas).
            pl.BlockSpec((bt, PDIMS[0]), lambda i: (i, 0)),
            # weights + packed bias: constant block index -> resident in VMEM.
            pl.BlockSpec((PDIMS[0], PDIMS[1]), lambda i: (0, 0)),
            pl.BlockSpec((PDIMS[1], PDIMS[2]), lambda i: (0, 0)),
            pl.BlockSpec((PDIMS[2], PDIMS[3]), lambda i: (0, 0)),
            pl.BlockSpec((PDIMS[3], PDIMS[4]), lambda i: (0, 0)),
            pl.BlockSpec((8, 256), lambda i: (0, 0)),
        ],
        out_specs=pl.BlockSpec((bt, PDIMS[-1]), lambda i: (i, 0)),
        compiler_params=pltpu.CompilerParams(
            dimension_semantics=("parallel",)),
        cost_estimate=pl.CostEstimate(
            flops=flops, transcendentals=0, bytes_accessed=bytes_accessed),
    )(x, w1, w2, w3, w4, b_packed)

    return out_padded[:B, :DIMS[-1]]


def cuore_reference(game_state, params):
    """Pure-JAX reference of the PyTorch forward."""
    x = game_state
    for (w, b) in params:
        x = jnp.maximum(x @ w + b, 0.0)
    return x + 1e-4


if __name__ == "__main__":
    key = jax.random.PRNGKey(0)
    kp, kx1, kx2 = jax.random.split(key, 3)

    params = init_params(kp)
    padded_ws, b_packed = pad_params(params)   # padded ONCE, reused every call
    memory = None  # unused by Cuore.forward (kept for signature parity)

    # Small batch (single grid step).
    B1 = 4
    gs1 = jax.random.normal(kx1, (B1, 325), jnp.float32)
    out1 = jax.block_until_ready(cuore_forward(gs1, padded_ws, b_packed))
    ref1 = cuore_reference(gs1, params)
    assert out1.shape == (B1, 52), out1.shape
    assert jnp.allclose(out1, ref1, atol=1e-5, rtol=1e-5), "mismatch vs reference (B=4)"

    # Larger batch: exercises the multi-tile grid + batch padding path.
    B2 = 300
    gs2 = jax.random.normal(kx2, (B2, 325), jnp.float32)
    out2 = jax.block_until_ready(cuore_forward(gs2, padded_ws, b_packed))
    ref2 = cuore_reference(gs2, params)
    assert out2.shape == (B2, 52), out2.shape
    assert jnp.allclose(out2, ref2, atol=1e-5, rtol=1e-5), "mismatch vs reference (B=300)"

    print("KERNEL_OK")
</pallas_src>

<mosaic_0001>
module attributes {stable_mosaic.version = 11 : i64} {
  func.func @cuore_kernel(%arg0: i32, %arg1: memref<8x384xf32, #tpu.memory_space<vmem>>, %arg2: memref<384x256xf32, #tpu.memory_space<vmem>>, %arg3: memref<256x256xf32, #tpu.memory_space<vmem>>, %arg4: memref<256x128xf32, #tpu.memory_space<vmem>>, %arg5: memref<128x128xf32, #tpu.memory_space<vmem>>, %arg6: memref<8x256xf32, #tpu.memory_space<vmem>>, %arg7: memref<8x128xf32, #tpu.memory_space<vmem>>) attributes {dimension_semantics = [#tpu.dimension_semantics<parallel>], iteration_bounds = array<i64: 1>, scalar_prefetch = 0 : i64, scratch_operands = 0 : i64, tpu.core_type = #tpu.core_type<tc>, window_params = [{transform_indices = @transform_0, window_bounds = array<i64: 8, 384>}, {pipeline_mode = #tpu.pipeline_mode<synchronous>, transform_indices = @transform_1, window_bounds = array<i64: 384, 256>}, {pipeline_mode = #tpu.pipeline_mode<synchronous>, transform_indices = @transform_2, window_bounds = array<i64: 256, 256>}, {pipeline_mode = #tpu.pipeline_mode<synchronous>, transform_indices = @transform_3, window_bounds = array<i64: 256, 128>}, {pipeline_mode = #tpu.pipeline_mode<synchronous>, transform_indices = @transform_4, window_bounds = array<i64: 128, 128>}, {pipeline_mode = #tpu.pipeline_mode<synchronous>, transform_indices = @transform_5, window_bounds = array<i64: 8, 256>}, {transform_indices = @transform_6, window_bounds = array<i64: 8, 128>}]} {
    %c0 = arith.constant 0 : index
    %c0_0 = arith.constant 0 : index
    %0 = vector.load %arg1[%c0, %c0_0] : memref<8x384xf32, #tpu.memory_space<vmem>>, vector<8x384xf32>
    %c0_1 = arith.constant 0 : index
    %c0_2 = arith.constant 0 : index
    %1 = vector.load %arg6[%c0_1, %c0_2] : memref<8x256xf32, #tpu.memory_space<vmem>>, vector<8x256xf32>
    %c0_3 = arith.constant 0 : index
    %c0_4 = arith.constant 0 : index
    %2 = vector.load %arg2[%c0_3, %c0_4] : memref<384x256xf32, #tpu.memory_space<vmem>>, vector<384x256xf32>
    %cst = arith.constant dense<0.000000e+00> : vector<8x256xf32>
    %3 = tpu.matmul %0, %2, %cst {dimension_numbers = #tpu.dot_dimension_numbers<[1], [0], [0], [1], [0, 0, 1, 1], [], []>} : vector<8x384xf32>, vector<384x256xf32>, vector<8x256xf32> -> vector<8x256xf32>
    %4 = vector.extract_strided_slice %1 {offsets = [0, 0], sizes = [1, 256], strides = [1, 1]} : vector<8x256xf32> to vector<1x256xf32>
    %5 = vector.broadcast %4 : vector<1x256xf32> to vector<8x256xf32>
    %6 = arith.addf %3, %5 : vector<8x256xf32>
    %cst_5 = arith.constant 0.000000e+00 : f32
    %7 = vector.broadcast %cst_5 : f32 to vector<8x256xf32>
    %8 = arith.maximumf %6, %7 : vector<8x256xf32>
    %c0_6 = arith.constant 0 : index
    %c0_7 = arith.constant 0 : index
    %9 = vector.load %arg3[%c0_6, %c0_7] : memref<256x256xf32, #tpu.memory_space<vmem>>, vector<256x256xf32>
    %cst_8 = arith.constant dense<0.000000e+00> : vector<8x256xf32>
    %10 = tpu.matmul %8, %9, %cst_8 {dimension_numbers = #tpu.dot_dimension_numbers<[1], [0], [0], [1], [0, 0, 1, 1], [], []>} : vector<8x256xf32>, vector<256x256xf32>, vector<8x256xf32> -> vector<8x256xf32>
    %11 = vector.extract_strided_slice %1 {offsets = [1, 0], sizes = [1, 256], strides = [1, 1]} : vector<8x256xf32> to vector<1x256xf32>
    %12 = vector.broadcast %11 : vector<1x256xf32> to vector<8x256xf32>
    %13 = arith.addf %10, %12 : vector<8x256xf32>
    %cst_9 = arith.constant 0.000000e+00 : f32
    %14 = vector.broadcast %cst_9 : f32 to vector<8x256xf32>
    %15 = arith.maximumf %13, %14 : vector<8x256xf32>
    %c0_10 = arith.constant 0 : index
    %c0_11 = arith.constant 0 : index
    %16 = vector.load %arg4[%c0_10, %c0_11] : memref<256x128xf32, #tpu.memory_space<vmem>>, vector<256x128xf32>
    %cst_12 = arith.constant dense<0.000000e+00> : vector<8x128xf32>
    %17 = tpu.matmul %15, %16, %cst_12 {dimension_numbers = #tpu.dot_dimension_numbers<[1], [0], [0], [1], [0, 0, 1, 1], [], []>} : vector<8x256xf32>, vector<256x128xf32>, vector<8x128xf32> -> vector<8x128xf32>
    %18 = vector.extract_strided_slice %1 {offsets = [2, 0], sizes = [1, 128], strides = [1, 1]} : vector<8x256xf32> to vector<1x128xf32>
    %19 = vector.broadcast %18 : vector<1x128xf32> to vector<8x128xf32>
    %20 = arith.addf %17, %19 : vector<8x128xf32>
    %cst_13 = arith.constant 0.000000e+00 : f32
    %21 = vector.broadcast %cst_13 : f32 to vector<8x128xf32>
    %22 = arith.maximumf %20, %21 : vector<8x128xf32>
    %c0_14 = arith.constant 0 : index
    %c0_15 = arith.constant 0 : index
    %23 = vector.load %arg5[%c0_14, %c0_15] : memref<128x128xf32, #tpu.memory_space<vmem>>, vector<128x128xf32>
    %cst_16 = arith.constant dense<0.000000e+00> : vector<8x128xf32>
    %24 = tpu.matmul %22, %23, %cst_16 {dimension_numbers = #tpu.dot_dimension_numbers<[1], [0], [0], [1], [0, 0, 1, 1], [], []>} : vector<8x128xf32>, vector<128x128xf32>, vector<8x128xf32> -> vector<8x128xf32>
    %25 = vector.extract_strided_slice %1 {offsets = [3, 0], sizes = [1, 128], strides = [1, 1]} : vector<8x256xf32> to vector<1x128xf32>
    %26 = vector.broadcast %25 : vector<1x128xf32> to vector<8x128xf32>
    %27 = arith.addf %24, %26 : vector<8x128xf32>
    %cst_17 = arith.constant 0.000000e+00 : f32
    %28 = vector.broadcast %cst_17 : f32 to vector<8x128xf32>
    %29 = arith.maximumf %27, %28 : vector<8x128xf32>
    %cst_18 = arith.constant 9.99999974E-5 : f32
    %30 = vector.broadcast %cst_18 : f32 to vector<8x128xf32>
    %31 = arith.addf %29, %30 : vector<8x128xf32>
    %c0_19 = arith.constant 0 : index
    %c0_20 = arith.constant 0 : index
    %32 = vector.load %arg7[%c0_19, %c0_20] : memref<8x128xf32, #tpu.memory_space<vmem>>, vector<8x128xf32>
    tpu.vector_store %arg7[%c0_19, %c0_20], %31 {strides = array<i32>} : memref<8x128xf32, #tpu.memory_space<vmem>>, vector<8x128xf32>,
    return
  }
  func.func @transform_0(%arg0: i32) -> (i32, i32) {
    %c0_i32 = arith.constant 0 : i32
    %c0_i32_0 = arith.constant 0 : i32
    return %arg0, %c0_i32 : i32, i32
  }
  func.func @transform_1(%arg0: i32) -> (i32, i32) {
    %c0_i32 = arith.constant 0 : i32
    %c0_i32_0 = arith.constant 0 : i32
    %c0_i32_1 = arith.constant 0 : i32
    return %c0_i32, %c0_i32_0 : i32, i32
  }
  func.func @transform_2(%arg0: i32) -> (i32, i32) {
    %c0_i32 = arith.constant 0 : i32
    %c0_i32_0 = arith.constant 0 : i32
    %c0_i32_1 = arith.constant 0 : i32
    return %c0_i32, %c0_i32_0 : i32, i32
  }
  func.func @transform_3(%arg0: i32) -> (i32, i32) {
    %c0_i32 = arith.constant 0 : i32
    %c0_i32_0 = arith.constant 0 : i32
    %c0_i32_1 = arith.constant 0 : i32
    return %c0_i32, %c0_i32_0 : i32, i32
  }
  func.func @transform_4(%arg0: i32) -> (i32, i32) {
    %c0_i32 = arith.constant 0 : i32
    %c0_i32_0 = arith.constant 0 : i32
    %c0_i32_1 = arith.constant 0 : i32
    return %c0_i32, %c0_i32_0 : i32, i32
  }
  func.func @transform_5(%arg0: i32) -> (i32, i32) {
    %c0_i32 = arith.constant 0 : i32
    %c0_i32_0 = arith.constant 0 : i32
    %c0_i32_1 = arith.constant 0 : i32
    return %c0_i32, %c0_i32_0 : i32, i32
  }
  func.func @transform_6(%arg0: i32) -> (i32, i32) {
    %c0_i32 = arith.constant 0 : i32
    %c0_i32_0 = arith.constant 0 : i32
    return %arg0, %c0_i32 : i32, i32
  }
}

</mosaic_0001>

<bundles_post_ra>
// kernel: cuore_forward.1
= control target key start
LH: loop header
LB: loop body
LE: loop exit
PB: predicated region body
PF: predicated region fallthrough
CT: control target
= control target key end

     0   :  { %11 = vsyncpa [#allocation3], 0  ;;  %s1232_s0 = inlined_call_operand.vmem [shape: f32[8,384], index: 0, kind: input, shape index: {}]   ;;  %s1233_s1 = inlined_call_operand.hbm [shape: f32[384,256], index: 1, kind: input, shape index: {}]   ;;  %s1234_s2 = inlined_call_operand.hbm [shape: f32[256,256], index: 2, kind: input, shape index: {}]   ;;  %s1235_s3 = inlined_call_operand.hbm [shape: f32[256,128], index: 3, kind: input, shape index: {}]   ;;  %s1236_s4 = inlined_call_operand.hbm [shape: f32[128,128], index: 4, kind: input, shape index: {}]   ;;  %s1237_s5 = inlined_call_operand.vmem [shape: f32[8,256], index: 5, kind: input, shape index: {}]   ;;  %s1238_s6 = inlined_call_operand.vmem [shape: f32[8,128], index: 6, kind: output, shape index: {}]  }
   0x1   :  { %12 = vsyncpa [#allocation5], 0 }
   0x2   :  { %13 = vsyncpa [#allocation8], 0  ;;  %s1095_s21 = smov [#allocation4]   ;;  %s1096_s23 = smov [#allocation2]  }
   0x3   :  { %s33_s22 = sshll.u32 %s1095_s21, 4  ;;  %s21_s24 = sshll.u32 %s1096_s23, 4  ;;  %s34_s22 = int_to_ptr.vmem [resolvable:$true] %s33_s22  ;;  %s1141_s24 = int_to_ptr.vmem [resolvable:$true] %s21_s24 }
   0x4   :  { %s1001_s27 = scalar_lea.hbm %s1234_s2, 8192 }
   0x5   :  { %p1002_p0 = scmp.ne.s32.totalorder %s1234_s2, %s1001_s27  ;;  %p1005_p1 = scmp.lt.u32.totalorder %s1001_s27, %s1234_s2 }
   0x7   :  { %p1007_p2 = pnand %p1005_p1, %p1002_p0 }
   0x9   :  { %1010 = shalt.err (!%p1007_p2)
}
   0xa   :  { %s1011_s8 = scalar_lea.vmem %s34_s22, 8192  ;;  %p1016_p4 = scmp.lt.s32.totalorder %s34_s22, %s34_s22 }
   0xb   :  { %p1012_p3 = scmp.ne.s32.totalorder %s34_s22, %s1011_s8  ;;  %p1017_p5 = scmp.lt.s32.totalorder %s1011_s8, %s1011_s8 }
   0xd   :  { %p1018_p6 = por %p1017_p5, %p1016_p4 }
   0xf   :  { %p1019_p7 = pnand %p1018_p6, %p1012_p3 }
  0x11   :  { %1022 = shalt.err (!%p1019_p7)
}
  0x12   :  { %s1097_s9 = smov 256   ;;  %s1098_s10 = smov 16  }
  0x13   :  { %39 = dma.hbm_to_vmem [thread:$0]  %s1234_s2, 8192, %s34_s22, [#allocation5], %s1097_s9, %s1097_s9, %s1098_s10  }
  0x14   :  { %s1023_s15 = scalar_lea.hbm %s1233_s1, 12288 }
  0x15   :  { %p1024_p8 = scmp.ne.s32.totalorder %s1233_s1, %s1023_s15  ;;  %p1027_p9 = scmp.lt.u32.totalorder %s1023_s15, %s1233_s1 }
  0x17   :  { %p1029_p10 = pnand %p1027_p9, %p1024_p8 }
  0x19   :  { %1032 = shalt.err (!%p1029_p10)
}
  0x1a   :  { %s1033_s20 = scalar_lea.vmem %s1141_s24, 12288  ;;  %p1038_p12 = scmp.lt.s32.totalorder %s1141_s24, %s1141_s24 }
  0x1b   :  { %p1034_p11 = scmp.ne.s32.totalorder %s1141_s24, %s1033_s20  ;;  %p1039_p13 = scmp.lt.s32.totalorder %s1033_s20, %s1033_s20 }
  0x1d   :  { %p1040_p0 = por %p1039_p13, %p1038_p12 }
  0x1f   :  { %p1041_p1 = pnand %p1040_p0, %p1034_p11 }
  0x21   :  { %1044 = shalt.err (!%p1041_p1)
}
  0x22   :  { %27 = dma.hbm_to_vmem [thread:$0]  %s1233_s1, 12288, %s1141_s24, [#allocation3], %s1097_s9, %s1097_s9, %s1098_s10  }
  0x23   :  { %s1099_s22 = smov [#allocation6]   ;;  %s1045_s27 = scalar_lea.hbm %s1235_s3, 4096 }
  0x24   :  { %s45_s23 = sshll.u32 %s1099_s22, 4  ;;  %p1046_p2 = scmp.ne.s32.totalorder %s1235_s3, %s1045_s27  ;;  %s46_s23 = int_to_ptr.vmem [resolvable:$true] %s45_s23 }
  0x25   :  { %p1049_p3 = scmp.lt.u32.totalorder %s1045_s27, %s1235_s3 }
  0x27   :  { %p1051_p4 = pnand %p1049_p3, %p1046_p2 }
  0x29   :  { %1054 = shalt.err (!%p1051_p4)
}
  0x2a   :  { %s1055_s8 = scalar_lea.vmem %s46_s23, 4096  ;;  %p1060_p6 = scmp.lt.s32.totalorder %s46_s23, %s46_s23 }
  0x2b   :  { %p1056_p5 = scmp.ne.s32.totalorder %s46_s23, %s1055_s8  ;;  %p1061_p7 = scmp.lt.s32.totalorder %s1055_s8, %s1055_s8 }
  0x2d   :  { %p1062_p8 = por %p1061_p7, %p1060_p6 }
  0x2f   :  { %p1063_p9 = pnand %p1062_p8, %p1056_p5 }
  0x31   :  { %1066 = shalt.err (!%p1063_p9)
}
  0x32   :  { %s1100_s1 = smov 128   ;;  %s1101_s24 = smov 8  }
  0x33   :  { %51 = dma.hbm_to_vmem [thread:$0]  %s1235_s3, 4096, %s46_s23, [#allocation5], %s1100_s1, %s1100_s1, %s1101_s24  }
  0x34   :  { %s1102_s11 = smov [#allocation7]   ;;  %s1067_s15 = scalar_lea.hbm %s1236_s4, 2048 }
  0x35   :  { %s57_s12 = sshll.u32 %s1102_s11, 4  ;;  %p1068_p10 = scmp.ne.s32.totalorder %s1236_s4, %s1067_s15  ;;  %s58_s12 = int_to_ptr.vmem [resolvable:$true] %s57_s12 }
  0x36   :  { %p1071_p11 = scmp.lt.u32.totalorder %s1067_s15, %s1236_s4 }
  0x38   :  { %p1073_p12 = pnand %p1071_p11, %p1068_p10 }
  0x3a   :  { %1076 = shalt.err (!%p1073_p12)
}
  0x3b   :  { %s1077_s20 = scalar_lea.vmem %s58_s12, 2048  ;;  %p1082_p0 = scmp.lt.s32.totalorder %s58_s12, %s58_s12 }
  0x3c   :  { %p1078_p13 = scmp.ne.s32.totalorder %s58_s12, %s1077_s20  ;;  %p1083_p1 = scmp.lt.s32.totalorder %s1077_s20, %s1077_s20 }
  0x3e   :  { %p1084_p2 = por %p1083_p1, %p1082_p0 }
  0x40   :  { %p1085_p3 = pnand %p1084_p2, %p1078_p13 }
  0x42   :  { %1088 = shalt.err (!%p1085_p3)
}
  0x43   :  { %63 = dma.hbm_to_vmem [thread:$0]  %s1236_s4, 2048, %s58_s12, [#allocation8], %s1100_s1, %s1100_s1, %s1101_s24  }
  0x44   :  { %1089 = dma.done.wait [#allocation3], 12288  }
  0x45   :  { %1090 = vsyncadd [#allocation3], 4294955008 }
  0x46   :  { %1091 = dma.done.wait [#allocation5], 12288  }
  0x47   :  { %1092 = vsyncadd [#allocation5], 4294955008 }
  0x48   :  { %1093 = dma.done.wait [#allocation8], 2048  }
  0x49   :  { %1094 = vsyncadd [#allocation8], 4294965248  ;;  %v84_v0 = vld [vmem:[#allocation2 + $0x8] sm:$0xff]  ;;  %v86_v1 = vld [vmem:[#allocation2 + $0x18] sm:$0xff]  ;;  %vm1105_vm0 = vmmov 0  }
  0x4a   :  { %v83_v2 = vld [vmem:[#allocation2] sm:$0xff]  ;;  %v770_v3 = vpack.c.bf16 %v86_v1, %v84_v0  ;;  %v85_v4 = vld [vmem:[#allocation2 + $0x10] sm:$0xff]  ;;  %v88_v5 = vld [vmem:[#allocation2 + $0x28] sm:$0xff] }
  0x4b   :  { %v90_v6 = vld [vmem:[#allocation2 + $0x38] sm:$0xff]  ;;  %v772_v7 = vpack.c.bf16 %v85_v4, %v83_v2  ;;  %v87_v9 = vld [vmem:[#allocation2 + $0x20] sm:$0xff]  ;;  %v89_v10 = vld [vmem:[#allocation2 + $0x30] sm:$0xff] }
  0x4c   :  { %v774_v8 = vpack.c.bf16 %v90_v6, %v88_v5  ;;  %v92_v11 = vld [vmem:[#allocation2 + $0x48] sm:$0xff]  ;;  %771 = vmatprep.subr.bf16.mxu0 %v770_v3  ;;  %v94_v12 = vld [vmem:[#allocation2 + $0x58] sm:$0xff]  ;;  %v776_v13 = vpack.c.bf16 %v89_v10, %v87_v9  ;;  %v91_v15 = vld [vmem:[#allocation2 + $0x40] sm:$0xff] }
  0x4d   :  { %773 = vmatpush1.bf16.msra.mxu0 %v772_v7  ;;  %v778_v14 = vpack.c.bf16 %v94_v12, %v92_v11  ;;  %v93_v16 = vld [vmem:[#allocation2 + $0x50] sm:$0xff]  ;;  %v96_v17 = vld [vmem:[#allocation2 + $0x68] sm:$0xff]  ;;  %v98_v18 = vld [vmem:[#allocation2 + $0x78] sm:$0xff] }
  0x4e   :  { %775 = vmatprep.subr.bf16.mxu0 %v774_v8  ;;  %v780_v19 = vpack.c.bf16 %v93_v16, %v91_v15  ;;  %v782_v20 = vpack.c.bf16 %v98_v18, %v96_v17  ;;  %v95_v21 = vld [vmem:[#allocation2 + $0x60] sm:$0xff]  ;;  %v97_v22 = vld [vmem:[#allocation2 + $0x70] sm:$0xff]  ;;  %v100_v23 = vld [vmem:[#allocation2 + $0x88] sm:$0xff] }
  0x4f   :  { %v102_v24 = vld [vmem:[#allocation2 + $0x98] sm:$0xff]  ;;  %v784_v25 = vpack.c.bf16 %v97_v22, %v95_v21  ;;  %v99_v27 = vld [vmem:[#allocation2 + $0x80] sm:$0xff]  ;;  %v101_v28 = vld [vmem:[#allocation2 + $0x90] sm:$0xff] }
  0x50   :  { %v786_v26 = vpack.c.bf16 %v102_v24, %v100_v23  ;;  %v104_v29 = vld [vmem:[#allocation2 + $0xa8] sm:$0xff]  ;;  %v106_v30 = vld [vmem:[#allocation2 + $0xb8] sm:$0xff]  ;;  %v788_v31 = vpack.c.bf16 %v101_v28, %v99_v27  ;;  %v103_v33 = vld [vmem:[#allocation2 + $0xa0] sm:$0xff] }
  0x51   :  { %777 = vmatpush1.bf16.msra.mxu0 %v776_v13  ;;  %v790_v32 = vpack.c.bf16 %v106_v30, %v104_v29  ;;  %v105_v34 = vld [vmem:[#allocation2 + $0xb0] sm:$0xff]  ;;  %v108_v35 = vld [vmem:[#allocation2 + $0xc8] sm:$0xff]  ;;  %v110_v36 = vld [vmem:[#allocation2 + $0xd8] sm:$0xff] }
  0x52   :  { %779 = vmatprep.subr.bf16.mxu0 %v778_v14  ;;  %v792_v37 = vpack.c.bf16 %v105_v34, %v103_v33  ;;  %v794_v38 = vpack.c.bf16 %v110_v36, %v108_v35  ;;  %v107_v39 = vld [vmem:[#allocation2 + $0xc0] sm:$0xff]  ;;  %v109_v40 = vld [vmem:[#allocation2 + $0xd0] sm:$0xff]  ;;  %v79_v41 = vld [vmem:[%s1232_s0 + $0x8] sm:$0xff] }
  0x53   :  { %v112_v42 = vld [vmem:[#allocation2 + $0xe8] sm:$0xff]  ;;  %v114_v43 = vld [vmem:[#allocation2 + $0xf8] sm:$0xff]  ;;  %251 = vmatprep.mubr.f32.mxu0 %v79_v41  ;;  %v796_v44 = vpack.c.bf16 %v109_v40, %v107_v39  ;;  %v111_v46 = vld [vmem:[#allocation2 + $0xe0] sm:$0xff] }
  0x54   :  { %v798_v45 = vpack.c.bf16 %v114_v43, %v112_v42  ;;  %v113_v47 = vld [vmem:[#allocation2 + $0xf0] sm:$0xff]  ;;  %v116_v48 = vld [vmem:[#allocation2 + $0x108] sm:$0xff]  ;;  %v118_v49 = vld [vmem:[#allocation2 + $0x118] sm:$0xff] }
  0x55   :  { %781 = vmatpush1.bf16.msra.mxu0 %v780_v19  ;;  %v800_v50 = vpack.c.bf16 %v113_v47, %v111_v46  ;;  %v802_v51 = vpack.c.bf16 %v118_v49, %v116_v48  ;;  %v115_v52 = vld [vmem:[#allocation2 + $0x100] sm:$0xff]  ;;  %v117_v53 = vld [vmem:[#allocation2 + $0x110] sm:$0xff]  ;;  %v120_v54 = vld [vmem:[#allocation2 + $0x128] sm:$0xff] }
  0x56   :  { %783 = vmatprep.subr.bf16.mxu0 %v782_v20  ;;  %v122_v55 = vld [vmem:[#allocation2 + $0x138] sm:$0xff]  ;;  %v119_v56 = vld [vmem:[#allocation2 + $0x120] sm:$0xff]  ;;  %v804_v57 = vpack.c.bf16 %v117_v53, %v115_v52  ;;  %v121_v58 = vld [vmem:[#allocation2 + $0x130] sm:$0xff] }
  0x57   :  { %v124_v59 = vld [vmem:[#allocation2 + $0x148] sm:$0xff]  ;;  %v126_v60 = vld [vmem:[#allocation2 + $0x158] sm:$0xff]  ;;  %v806_v61 = vpack.c.bf16 %v122_v55, %v120_v54  ;;  %v331_v0 = vld [vmem:[#allocation4] sm:$0xff]  ;;  %v808_v10 = vpack.c.bf16 %v121_v58, %v119_v56 }
  0x58   :  { %v332_v62 = vld [vmem:[#allocation4 + $0x8] sm:$0xff]  ;;  %v334_v63 = vld [vmem:[#allocation4 + $0x18] sm:$0xff]  ;;  %v333_v2 = vld [vmem:[#allocation4 + $0x10] sm:$0xff]  ;;  %v810_v12 = vpack.c.bf16 %v126_v60, %v124_v59 }
  0x59   :  { %785 = vmatpush1.bf16.msra.mxu0 %v784_v25  ;;  %v866_v1 = vpack.c.bf16 %v334_v63, %v332_v62  ;;  %v336_v3 = vld [vmem:[#allocation4 + $0x28] sm:$0xff]  ;;  %v338_v4 = vld [vmem:[#allocation4 + $0x38] sm:$0xff]  ;;  %v868_v5 = vpack.c.bf16 %v333_v2, %v331_v0  ;;  %v335_v7 = vld [vmem:[#allocation4 + $0x20] sm:$0xff] }
  0x5a   :  { %787 = vmatprep.subr.bf16.mxu0 %v786_v26  ;;  %v870_v6 = vpack.c.bf16 %v338_v4, %v336_v3  ;;  %v337_v8 = vld [vmem:[#allocation4 + $0x30] sm:$0xff]  ;;  %v340_v9 = vld [vmem:[#allocation4 + $0x48] sm:$0xff]  ;;  %v342_v11 = vld [vmem:[#allocation4 + $0x58] sm:$0xff] }
  0x5b   :  { %867 = vmatprep.subr.bf16.mxu1 %v866_v1  ;;  %v123_v13 = vld [vmem:[#allocation2 + $0x140] sm:$0xff]  ;;  %v125_v14 = vld [vmem:[#allocation2 + $0x150] sm:$0xff]  ;;  %v128_v15 = vld [vmem:[#allocation2 + $0x168] sm:$0xff]  ;;  %v872_v16 = vpack.c.bf16 %v337_v8, %v335_v7  ;;  %v874_v18 = vpack.c.bf16 %v342_v11, %v340_v9 }
  0x5c   :  { %869 = vmatpush1.bf16.msra.mxu1 %v868_v5  ;;  %v130_v17 = vld [vmem:[#allocation2 + $0x178] sm:$0xff]  ;;  %v339_v19 = vld [vmem:[#allocation4 + $0x40] sm:$0xff]  ;;  %v341_v20 = vld [vmem:[#allocation4 + $0x50] sm:$0xff]  ;;  %v812_v23 = vpack.c.bf16 %v125_v14, %v123_v13 }
  0x5d   :  { %789 = vmatpush1.bf16.msra.mxu0 %v788_v31  ;;  %871 = vmatprep.subr.bf16.mxu1 %v870_v6  ;;  %v344_v21 = vld [vmem:[#allocation4 + $0x68] sm:$0xff]  ;;  %v346_v22 = vld [vmem:[#allocation4 + $0x78] sm:$0xff]  ;;  %v814_v24 = vpack.c.bf16 %v130_v17, %v128_v15  ;;  %v127_v25 = vld [vmem:[#allocation2 + $0x160] sm:$0xff]  ;;  %v876_v28 = vpack.c.bf16 %v341_v20, %v339_v19 }
  0x5e   :  { %791 = vmatprep.subr.bf16.mxu0 %v790_v32  ;;  %v129_v26 = vld [vmem:[#allocation2 + $0x170] sm:$0xff]  ;;  %v132_v27 = vld [vmem:[#allocation2 + $0x188] sm:$0xff]  ;;  %v134_v29 = vld [vmem:[#allocation2 + $0x198] sm:$0xff]  ;;  %v878_v30 = vpack.c.bf16 %v346_v22, %v344_v21 }
  0x5f   :  { %v343_v31 = vld [vmem:[#allocation4 + $0x60] sm:$0xff]  ;;  %v345_v32 = vld [vmem:[#allocation4 + $0x70] sm:$0xff]  ;;  %v348_v33 = vld [vmem:[#allocation4 + $0x88] sm:$0xff]  ;;  %v816_v35 = vpack.c.bf16 %v129_v26, %v127_v25  ;;  %v818_v36 = vpack.c.bf16 %v134_v29, %v132_v27 }
  0x60   :  { %873 = vmatpush1.bf16.msra.mxu1 %v872_v16  ;;  %v350_v34 = vld [vmem:[#allocation4 + $0x98] sm:$0xff]  ;;  %v136_v39 = vld [vmem:[#allocation2 + $0x1a8] sm:$0xff]  ;;  %v880_v40 = vpack.c.bf16 %v345_v32, %v343_v31  ;;  %v347_v43 = vld [vmem:[#allocation4 + $0x80] sm:$0xff] }
  0x61   :  { %793 = vmatpush1.bf16.msra.mxu0 %v792_v37  ;;  %875 = vmatprep.subr.bf16.mxu1 %v874_v18  ;;  %v131_v37 = vld [vmem:[#allocation2 + $0x180] sm:$0xff]  ;;  %v138_v41 = vld [vmem:[#allocation2 + $0x1b8] sm:$0xff]  ;;  %v882_v42 = vpack.c.bf16 %v350_v34, %v348_v33  ;;  %v353_v56 = vld [vmem:[#allocation4 + $0xb0] sm:$0xff] }
  0x62   :  { %795 = vmatprep.subr.bf16.mxu0 %v794_v38  ;;  %v133_v38 = vld [vmem:[#allocation2 + $0x190] sm:$0xff]  ;;  %v354_v46 = vld [vmem:[#allocation4 + $0xb8] sm:$0xff]  ;;  %v822_v48 = vpack.c.bf16 %v138_v41, %v136_v39  ;;  %v135_v49 = vld [vmem:[#allocation2 + $0x1a0] sm:$0xff] }
  0x63   :  { %v820_v47 = vpack.c.bf16 %v133_v38, %v131_v37  ;;  %v142_v53 = vld [vmem:[#allocation2 + $0x1d8] sm:$0xff]  ;;  %v351_v55 = vld [vmem:[#allocation4 + $0xa0] sm:$0xff]  ;;  %v141_v62 = vld [vmem:[#allocation2 + $0x1d0] sm:$0xff] }
  0x64   :  { %877 = vmatpush1.bf16.msra.mxu1 %v876_v28  ;;  %v358_v58 = vld [vmem:[#allocation4 + $0xd8] sm:$0xff]  ;;  %v144_v63 = vld [vmem:[#allocation2 + $0x1e8] sm:$0xff]  ;;  %v888_v0 = vpack.c.bf16 %v353_v56, %v351_v55  ;;  %v355_v3 = vld [vmem:[#allocation4 + $0xc0] sm:$0xff] }
  0x65   :  { %797 = vmatpush1.bf16.msra.mxu0 %v796_v44  ;;  %879 = vmatprep.subr.bf16.mxu1 %v878_v30  ;;  %v349_v44 = vld [vmem:[#allocation4 + $0x90] sm:$0xff]  ;;  %v146_v1 = vld [vmem:[#allocation2 + $0x1f8] sm:$0xff]  ;;  %v360_v5 = vld [vmem:[#allocation4 + $0xe8] sm:$0xff] }
  0x66   :  { %799 = vmatprep.subr.bf16.mxu0 %v798_v45  ;;  %v352_v45 = vld [vmem:[#allocation4 + $0xa8] sm:$0xff]  ;;  %v884_v52 = vpack.c.bf16 %v349_v44, %v347_v43  ;;  %v357_v4 = vld [vmem:[#allocation4 + $0xd0] sm:$0xff]  ;;  %v362_v6 = vld [vmem:[#allocation4 + $0xf8] sm:$0xff]  ;;  %v830_v8 = vpack.c.bf16 %v146_v1, %v144_v63 }
  0x67   :  { %v886_v54 = vpack.c.bf16 %v354_v46, %v352_v45  ;;  %v143_v9 = vld [vmem:[#allocation2 + $0x1e0] sm:$0xff]  ;;  %v148_v11 = vld [vmem:[#allocation2 + $0x208] sm:$0xff]  ;;  %v150_v13 = vld [vmem:[#allocation2 + $0x218] sm:$0xff]  ;;  %v894_v14 = vpack.c.bf16 %v362_v6, %v360_v5  ;;  %v1103_v45 = vmov 0.0  }
  0x68   :  { %881 = vmatpush1.bf16.msra.mxu1 %v880_v40  ;;  %v359_v15 = vld [vmem:[#allocation4 + $0xe0] sm:$0xff]  ;;  %v361_v16 = vld [vmem:[#allocation4 + $0xf0] sm:$0xff]  ;;  %v364_v17 = vld [vmem:[#allocation4 + $0x108] sm:$0xff]  ;;  %v834_v20 = vpack.c.bf16 %v150_v13, %v148_v11 }
  0x69   :  { %801 = vmatpush1.bf16.msra.mxu0 %v800_v50  ;;  %v137_v50 = vld [vmem:[#allocation2 + $0x1b0] sm:$0xff]  ;;  %883 = vmatprep.subr.bf16.mxu1 %v882_v42  ;;  %v366_v18 = vld [vmem:[#allocation4 + $0x118] sm:$0xff]  ;;  %v147_v21 = vld [vmem:[#allocation2 + $0x200] sm:$0xff] }
  0x6a   :  { %803 = vmatprep.subr.bf16.mxu0 %v802_v51  ;;  %v140_v51 = vld [vmem:[#allocation2 + $0x1c8] sm:$0xff]  ;;  %v824_v59 = vpack.c.bf16 %v137_v50, %v135_v49  ;;  %v149_v22 = vld [vmem:[#allocation2 + $0x210] sm:$0xff]  ;;  %v154_v25 = vld [vmem:[#allocation2 + $0x238] sm:$0xff]  ;;  %v898_v26 = vpack.c.bf16 %v366_v18, %v364_v17 }
  0x6b   :  { %v826_v60 = vpack.c.bf16 %v142_v53, %v140_v51  ;;  %v363_v27 = vld [vmem:[#allocation4 + $0x100] sm:$0xff]  ;;  %v365_v28 = vld [vmem:[#allocation4 + $0x110] sm:$0xff]  ;;  %v368_v29 = vld [vmem:[#allocation4 + $0x128] sm:$0xff]  ;;  %v836_v32 = vpack.c.bf16 %v149_v22, %v147_v21 }
  0x6c   :  { %885 = vmatpush1.bf16.msra.mxu1 %v884_v52  ;;  %v370_v30 = vld [vmem:[#allocation4 + $0x138] sm:$0xff]  ;;  %v78_v31 = vld [vmem:[%s1232_s0] sm:$0xff]  ;;  %v900_v37 = vpack.c.bf16 %v365_v28, %v363_v27  ;;  %v369_v41 = vld [vmem:[#allocation4 + $0x130] sm:$0xff] }
  0x6d   :  { %805 = vmatpush1.bf16.msra.mxu0 %v804_v57  ;;  %v356_v57 = vld [vmem:[#allocation4 + $0xc8] sm:$0xff]  ;;  %887 = vmatprep.subr.bf16.mxu1 %v886_v54  ;;  %v151_v34 = vld [vmem:[#allocation2 + $0x220] sm:$0xff]  ;;  %v158_v38 = vld [vmem:[#allocation2 + $0x258] sm:$0xff]  ;;  %v902_v39 = vpack.c.bf16 %v370_v30, %v368_v29 }
  0x6e   :  { %807 = vmatprep.subr.bf16.mxu0 %v806_v61  ;;  %v139_v61 = vld [vmem:[#allocation2 + $0x1c0] sm:$0xff]  ;;  %v890_v2 = vpack.c.bf16 %v358_v58, %v356_v57  ;;  %v372_v42 = vld [vmem:[#allocation4 + $0x148] sm:$0xff]  ;;  %v374_v43 = vld [vmem:[#allocation4 + $0x158] sm:$0xff] }
  0x6f   :  { %v828_v7 = vpack.c.bf16 %v141_v62, %v139_v61  ;;  %v367_v40 = vld [vmem:[#allocation4 + $0x120] sm:$0xff]  ;;  %v160_v49 = vld [vmem:[#allocation2 + $0x268] sm:$0xff]  ;;  %v162_v51 = vld [vmem:[#allocation2 + $0x278] sm:$0xff]  ;;  %v906_v52 = vpack.c.bf16 %v374_v43, %v372_v42 }
  0x70   :  { %889 = vmatpush1.bf16.msra.mxu1 %v888_v0  ;;  %v904_v50 = vpack.c.bf16 %v369_v41, %v367_v40  ;;  %v371_v53 = vld [vmem:[#allocation4 + $0x140] sm:$0xff]  ;;  %v373_v54 = vld [vmem:[#allocation4 + $0x150] sm:$0xff]  ;;  %v376_v55 = vld [vmem:[#allocation4 + $0x168] sm:$0xff]  ;;  %v846_v58 = vpack.c.bf16 %v162_v51, %v160_v49 }
  0x71   :  { %809 = vmatpush1.bf16.msra.mxu0 %v808_v10  ;;  %v145_v10 = vld [vmem:[#allocation2 + $0x1f0] sm:$0xff]  ;;  %891 = vmatprep.subr.bf16.mxu1 %v890_v2  ;;  %v378_v56 = vld [vmem:[#allocation4 + $0x178] sm:$0xff]  ;;  %v164_v61 = vld [vmem:[#allocation2 + $0x288] sm:$0xff]  ;;  %v908_v62 = vpack.c.bf16 %v373_v54, %v371_v53 }
  0x72   :  { %811 = vmatprep.subr.bf16.mxu0 %v810_v12  ;;  %v892_v12 = vpack.c.bf16 %v357_v4, %v355_v3  ;;  %v832_v19 = vpack.c.bf16 %v145_v10, %v143_v9  ;;  %v166_v63 = vld [vmem:[#allocation2 + $0x298] sm:$0xff]  ;;  %v910_v0 = vpack.c.bf16 %v378_v56, %v376_v55  ;;  %v375_v1 = vld [vmem:[#allocation4 + $0x160] sm:$0xff]  ;;  %v377_v2 = vld [vmem:[#allocation4 + $0x170] sm:$0xff]  ;;  %v179_v56 = vlaneseq }
  0x73   :  { %v380_v3 = vld [vmem:[#allocation4 + $0x188] sm:$0xff]  ;;  %v382_v4 = vld [vmem:[#allocation4 + $0x198] sm:$0xff]  ;;  %v850_v6 = vpack.c.bf16 %v166_v63, %v164_v61  ;;  %v912_v10 = vpack.c.bf16 %v377_v2, %v375_v1  ;;  %v379_v13 = vld [vmem:[#allocation4 + $0x180] sm:$0xff] }
  0x74   :  { %893 = vmatpush1.bf16.msra.mxu1 %v892_v12  ;;  %v168_v9 = vld [vmem:[#allocation2 + $0x2a8] sm:$0xff]  ;;  %v170_v11 = vld [vmem:[#allocation2 + $0x2b8] sm:$0xff]  ;;  %v914_v12 = vpack.c.bf16 %v382_v4, %v380_v3  ;;  %v177_v40 = vld [vmem:[#allocation2 + $0x2f0] sm:$0xff] }
  0x75   :  { %813 = vmatpush1.bf16.msra.mxu0 %v812_v23  ;;  %v152_v23 = vld [vmem:[#allocation2 + $0x228] sm:$0xff]  ;;  %895 = vmatprep.subr.bf16.mxu1 %v894_v14  ;;  %v381_v14 = vld [vmem:[#allocation4 + $0x190] sm:$0xff]  ;;  %v854_v18 = vpack.c.bf16 %v170_v11, %v168_v9  ;;  %v390_v28 = vld [vmem:[#allocation4 + $0x1d8] sm:$0xff] }
  0x76   :  { %815 = vmatprep.subr.bf16.mxu0 %v814_v24  ;;  %v896_v24 = vpack.c.bf16 %v361_v16, %v359_v15  ;;  %v838_v33 = vpack.c.bf16 %v154_v25, %v152_v23  ;;  %v384_v15 = vld [vmem:[#allocation4 + $0x1a8] sm:$0xff]  ;;  %v386_v16 = vld [vmem:[#allocation4 + $0x1b8] sm:$0xff]  ;;  %v916_v22 = vpack.c.bf16 %v381_v14, %v379_v13  ;;  %v383_v25 = vld [vmem:[#allocation4 + $0x1a0] sm:$0xff] }
  0x77   :  { %v172_v21 = vld [vmem:[#allocation2 + $0x2c8] sm:$0xff]  ;;  %v174_v23 = vld [vmem:[#allocation2 + $0x2d8] sm:$0xff]  ;;  %v80_v42 = vld [vmem:[%s1232_s0 + $0x10] sm:$0xff] }
  0x78   :  { %897 = vmatpush1.bf16.msra.mxu1 %v896_v24  ;;  %v918_v24 = vpack.c.bf16 %v386_v16, %v384_v15  ;;  %v388_v27 = vld [vmem:[#allocation4 + $0x1c8] sm:$0xff]  ;;  %v858_v30 = vpack.c.bf16 %v174_v23, %v172_v21  ;;  %v387_v43 = vld [vmem:[#allocation4 + $0x1c0] sm:$0xff]  ;;  %v393_v51 = vld [vmem:[#allocation4 + $0x1f0] sm:$0xff] }
  0x79   :  { %817 = vmatpush1.bf16.msra.mxu0 %v816_v35  ;;  %v153_v35 = vld [vmem:[#allocation2 + $0x230] sm:$0xff]  ;;  %899 = vmatprep.subr.bf16.mxu1 %v898_v26  ;;  %v492_v53 = vld [vmem:[#allocation6 + $0x80] sm:$0xff]  ;;  %v493_v54 = vld [vmem:[#allocation6 + $0x88] sm:$0xff] }
  0x7a   :  { %819 = vmatprep.subr.bf16.mxu0 %v818_v36  ;;  %v156_v36 = vld [vmem:[#allocation2 + $0x248] sm:$0xff]  ;;  %v840_v44 = vpack.c.bf16 %v153_v35, %v151_v34  ;;  %v385_v26 = vld [vmem:[#allocation4 + $0x1b0] sm:$0xff]  ;;  %v178_v35 = vld [vmem:[#allocation2 + $0x2f8] sm:$0xff]  ;;  %v930_v55 = vpack.c.bf16 %v493_v54, %v492_v53  ;;  %v1104_v54 = vmov 0.0|0.0  }
  0x7b   :  { %v842_v46 = vpack.c.bf16 %v158_v38, %v156_v36  ;;  %v176_v34 = vld [vmem:[#allocation2 + $0x2e8] sm:$0xff]  ;;  %v922_v36 = vpack.c.bf16 %v390_v28, %v388_v27  ;;  %v476_v2 = vld [vmem:[#allocation6] sm:$0xff]  ;;  %v478_v11 = vld [vmem:[#allocation6 + $0x10] sm:$0xff] }
  0x7c   :  { %901 = vmatpush1.bf16.msra.mxu1 %v900_v37  ;;  %v862_v38 = vpack.c.bf16 %v178_v35, %v176_v34  ;;  %v477_v3 = vld [vmem:[#allocation6 + $0x8] sm:$0xff]  ;;  %v496_v13 = vld [vmem:[#allocation6 + $0xa0] sm:$0xff]  ;;  %v482_v23 = vld [vmem:[#allocation6 + $0x30] sm:$0xff] }
  0x7d   :  { %821 = vmatpush1.bf16.msra.mxu0 %v820_v47  ;;  %v155_v47 = vld [vmem:[#allocation2 + $0x240] sm:$0xff]  ;;  %903 = vmatprep.subr.bf16.mxu1 %v902_v39  ;;  %v497_v14 = vld [vmem:[#allocation6 + $0xa8] sm:$0xff]  ;;  %v486_v35 = vld [vmem:[#allocation6 + $0x50] sm:$0xff] }
  0x7e   :  { %823 = vmatprep.subr.bf16.mxu0 %v822_v48  ;;  %v157_v48 = vld [vmem:[#allocation2 + $0x250] sm:$0xff]  ;;  %v175_v39 = vld [vmem:[#allocation2 + $0x2e0] sm:$0xff]  ;;  %v938_v16 = vpack.c.bf16 %v497_v14, %v496_v13 }
  0x7f   :  { %v844_v57 = vpack.c.bf16 %v157_v48, %v155_v47  ;;  %v864_v41 = vpack.c.bf16 %v177_v40, %v175_v39  ;;  %v392_v47 = vld [vmem:[#allocation4 + $0x1e8] sm:$0xff]  ;;  %v394_v48 = vld [vmem:[#allocation4 + $0x1f8] sm:$0xff]  ;;  %v585_v53 = vld [vmem:[#allocation7 + $0x10] sm:$0xff] }
  0x80   :  { %905 = vmatpush1.bf16.msra.mxu1 %v904_v50  ;;  %v926_v49 = vpack.c.bf16 %v394_v48, %v392_v47  ;;  %v391_v50 = vld [vmem:[#allocation4 + $0x1e0] sm:$0xff]  ;;  %v490_v48 = vld [vmem:[#allocation6 + $0x70] sm:$0xff] }
  0x81   :  { %825 = vmatpush1.bf16.msra.mxu0 %v824_v59  ;;  %v159_v59 = vld [vmem:[#allocation2 + $0x260] sm:$0xff]  ;;  %907 = vmatprep.subr.bf16.mxu1 %v906_v52  ;;  %v928_v52 = vpack.c.bf16 %v393_v51, %v391_v50 }
  0x82   :  { %827 = vmatprep.subr.bf16.mxu0 %v826_v60  ;;  %v161_v60 = vld [vmem:[#allocation2 + $0x270] sm:$0xff]  ;;  %v583_v51 = vld [vmem:[#allocation7] sm:$0xff] }
  0x83   :  { %v848_v5 = vpack.c.bf16 %v161_v60, %v159_v59  ;;  %v1212_v59 = vld [vmem:[%s1237_s5] sm:$0xff]  ;;  %v1217_v60 = vld [vmem:[%s1237_s5 + $0x8] sm:$0xff] }
  0x84   :  { %909 = vmatpush1.bf16.msra.mxu1 %v908_v62 }
  0x85   :  { %829 = vmatpush1.bf16.msra.mxu0 %v828_v7  ;;  %v163_v7 = vld [vmem:[#allocation2 + $0x280] sm:$0xff]  ;;  %911 = vmatprep.subr.bf16.mxu1 %v910_v0 }
  0x86   :  { %831 = vmatprep.subr.bf16.mxu0 %v830_v8  ;;  %v165_v8 = vld [vmem:[#allocation2 + $0x290] sm:$0xff] }
  0x87   :  { %v852_v17 = vpack.c.bf16 %v165_v8, %v163_v7  ;;  %v932_v8 = vpack.c.bf16 %v477_v3, %v476_v2  ;;  %v591_v3 = vld [vmem:[#allocation7 + $0x40] sm:$0xff] }
  0x88   :  { %913 = vmatpush1.bf16.msra.mxu1 %v912_v10 }
  0x89   :  { %833 = vmatpush1.bf16.msra.mxu0 %v832_v19  ;;  %v167_v19 = vld [vmem:[#allocation2 + $0x2a0] sm:$0xff]  ;;  %915 = vmatprep.subr.bf16.mxu1 %v914_v12  ;;  %v479_v12 = vld [vmem:[#allocation6 + $0x18] sm:$0xff] }
  0x8a   :  { %835 = vmatprep.subr.bf16.mxu0 %v834_v20  ;;  %v169_v20 = vld [vmem:[#allocation2 + $0x2b0] sm:$0xff]  ;;  %v936_v15 = vpack.c.bf16 %v479_v12, %v478_v11 }
  0x8b   :  { %v856_v29 = vpack.c.bf16 %v169_v20, %v167_v19  ;;  %v498_v19 = vld [vmem:[#allocation6 + $0xb0] sm:$0xff]  ;;  %v499_v20 = vld [vmem:[#allocation6 + $0xb8] sm:$0xff] }
  0x8c   :  { %252 = vmatmul.mubr.f32.vlgmr.msra.gmra.mrb[0].mxu0 %v78_v31  ;;  %v171_v31 = vld [vmem:[#allocation2 + $0x2c0] sm:$0xff]  ;;  %917 = vmatpush1.bf16.msra.mxu1 %v916_v22  ;;  %v942_v22 = vpack.c.bf16 %v499_v20, %v498_v19  ;;  %v596_v19 = vld [vmem:[#allocation7 + $0x68] sm:$0xff] }
  0x8d   :  { %837 = vmatpush1.bf16.msra.mxu0 %v836_v32  ;;  %322 = vmatprep.mubr.f32.mxu0 %v1103_v45  ;;  %v173_v32 = vld [vmem:[#allocation2 + $0x2d0] sm:$0xff] }
  0x8e   :  { %839 = vmatprep.subr.bf16.mxu0 %v838_v33  ;;  %v920_v33 = vpack.c.bf16 %v385_v26, %v383_v25  ;;  %919 = vmatprep.subr.bf16.mxu1 %v918_v24  ;;  %v860_v37 = vpack.c.bf16 %v173_v32, %v171_v31  ;;  %v483_v24 = vld [vmem:[#allocation6 + $0x38] sm:$0xff]  ;;  %v500_v25 = vld [vmem:[#allocation6 + $0xc0] sm:$0xff]  ;;  %v501_v26 = vld [vmem:[#allocation6 + $0xc8] sm:$0xff] }
  0x8f   :  { %v944_v27 = vpack.c.bf16 %v483_v24, %v482_v23  ;;  %v946_v28 = vpack.c.bf16 %v501_v26, %v500_v25  ;;  %v502_v31 = vld [vmem:[#allocation6 + $0xd0] sm:$0xff]  ;;  %v503_v32 = vld [vmem:[#allocation6 + $0xd8] sm:$0xff] }
  0x90   :  { %921 = vmatpush1.bf16.msra.mxu1 %v920_v33  ;;  %v950_v34 = vpack.c.bf16 %v503_v32, %v502_v31 }
  0x91   :  { %841 = vmatpush1.bf16.msra.mxu0 %v840_v44  ;;  %923 = vmatprep.subr.bf16.mxu1 %v922_v36  ;;  %v389_v44 = vld [vmem:[#allocation4 + $0x1d0] sm:$0xff]  ;;  %v487_v36 = vld [vmem:[#allocation6 + $0x58] sm:$0xff] }
  0x92   :  { %843 = vmatprep.subr.bf16.mxu0 %v842_v46  ;;  %v924_v46 = vpack.c.bf16 %v389_v44, %v387_v43  ;;  %v952_v39 = vpack.c.bf16 %v487_v36, %v486_v35  ;;  %v506_v44 = vld [vmem:[#allocation6 + $0xf0] sm:$0xff] }
  0x94   :  { %925 = vmatpush1.bf16.msra.mxu1 %v924_v46  ;;  %v507_v46 = vld [vmem:[#allocation6 + $0xf8] sm:$0xff] }
  0x95   :  { %845 = vmatpush1.bf16.msra.mxu0 %v844_v57  ;;  %927 = vmatprep.subr.bf16.mxu1 %v926_v49  ;;  %v1206_v57 = vshrl.u32 %v179_v56, 7  ;;  %v958_v47 = vpack.c.bf16 %v507_v46, %v506_v44  ;;  %v491_v49 = vld [vmem:[#allocation6 + $0x78] sm:$0xff] }
  0x96   :  { %847 = vmatprep.subr.bf16.mxu0 %v846_v58  ;;  %v960_v50 = vpack.c.bf16 %v491_v49, %v490_v48  ;;  %v586_v56 = vld [vmem:[#allocation7 + $0x18] sm:$0xff] }
  0x97   :  { %v181_v58 = vsub.s32 0, %v1206_v57 }
  0x98   :  { %929 = vmatpush1.bf16.msra.mxu1 %v928_v52  ;;  %v584_v52 = vld [vmem:[#allocation7 + $0x8] sm:$0xff] }
  0x99   :  { %849 = vmatpush1.bf16.msra.mxu0 %v848_v5  ;;  %931 = vmatprep.subr.bf16.mxu1 %v930_v55  ;;  %v182_v61 = vrot.slane %v1212_v59, %v181_v58  ;;  %v186_v62 = vrot.slane %v1217_v60, %v181_v58  ;;  %v494_v5 = vld [vmem:[#allocation6 + $0x90] sm:$0xff]  ;;  %v963_v55 = vpack.c.bf16 %v584_v52, %v583_v51 }
  0x9a   :  { %851 = vmatprep.subr.bf16.mxu0 %v850_v6  ;;  %v495_v6 = vld [vmem:[#allocation6 + $0x98] sm:$0xff]  ;;  %v966_v58 = vpack.c.bf16 %v586_v56, %v585_v53 }
  0x9b   :  { %v934_v10 = vpack.c.bf16 %v495_v6, %v494_v5  ;;  %v593_v6 = vld [vmem:[#allocation7 + $0x50] sm:$0xff] }
  0x9d   :  { %853 = vmatpush1.bf16.msra.mxu0 %v852_v17  ;;  %v480_v17 = vld [vmem:[#allocation6 + $0x20] sm:$0xff] }
  0x9e   :  { %855 = vmatprep.subr.bf16.mxu0 %v854_v18  ;;  %v481_v18 = vld [vmem:[#allocation6 + $0x28] sm:$0xff] }
  0x9f   :  { %v940_v21 = vpack.c.bf16 %v481_v18, %v480_v17  ;;  %v595_v18 = vld [vmem:[#allocation7 + $0x60] sm:$0xff] }
  0xa0   :  { %v981_v20 = vpack.c.bf16 %v596_v19, %v595_v18 }
  0xa1   :  { %857 = vmatpush1.bf16.msra.mxu0 %v856_v29  ;;  %v484_v29 = vld [vmem:[#allocation6 + $0x40] sm:$0xff] }
  0xa2   :  { %859 = vmatprep.subr.bf16.mxu0 %v858_v30  ;;  %v485_v30 = vld [vmem:[#allocation6 + $0x48] sm:$0xff] }
  0xa3   :  { %v948_v33 = vpack.c.bf16 %v485_v30, %v484_v29  ;;  %v601_v30 = vsub.s32 3, %v1206_v57 }
  0xa5   :  { %861 = vmatpush1.bf16.msra.mxu0 %v860_v37  ;;  %v504_v37 = vld [vmem:[#allocation6 + $0xe0] sm:$0xff]  ;;  %v602_v31 = vrot.slane %v1212_v59, %v601_v30 }
  0xa6   :  { %863 = vmatprep.subr.bf16.mxu0 %v862_v38  ;;  %v505_v38 = vld [vmem:[#allocation6 + $0xe8] sm:$0xff] }
  0xa7   :  { %v954_v40 = vpack.c.bf16 %v505_v38, %v504_v37 }
  0xa9   :  { %865 = vmatpush1.bf16.msra.mxu0 %v864_v41  ;;  %v488_v41 = vld [vmem:[#allocation6 + $0x60] sm:$0xff] }
  0xaa   :  { %962 = vmatprep.subr.bf16.mxu0 %v1104_v54 }
  0xac   :  { %323 = vmatmul.mubr.f32.vlgmr.msra.gmra.mrb[0].mxu0 %v80_v42  ;;  %v489_v42 = vld [vmem:[#allocation6 + $0x68] sm:$0xff] }
  0xad   :  { %v956_v43 = vpack.c.bf16 %v489_v42, %v488_v41  ;;  %964 = vmatpush3.bf16.msra.mxu0 %v963_v55  ;;  %767 = vmatprep.mubr.msk.f32.mxu0 %vm1105_vm0, %v1103_v45 }
  0xae   :  { %965 = vmatprep.subr.bf16.mxu0 %v1104_v54 }
  0xb1   :  { %967 = vmatpush3.bf16.msra.mxu0 %v966_v58 }
  0xb2   :  { %968 = vmatprep.subr.bf16.mxu0 %v1104_v54 }
 0x17f   :  { %v324_v63 = vpop.f32.mrb[0].mxu0 }
 0x180   :  { %v986_v0 = vadd.f32 %v324_v63, %v182_v61  ;;  %v326_v1 = vpop.f32.mrb[1].mxu0  ;;  %v587_v61 = vld [vmem:[#allocation7 + $0x20] sm:$0xff] }
 0x181   :  { %v987_v4 = vadd.f32 %v326_v1, %v186_v62  ;;  %v588_v62 = vld [vmem:[#allocation7 + $0x28] sm:$0xff]  ;;  %v590_v1 = vld [vmem:[#allocation7 + $0x38] sm:$0xff] }
 0x182   :  { %v329_v9 = vmax.f32 %v986_v0, 0.0  ;;  %v969_v63 = vpack.c.bf16 %v588_v62, %v587_v61  ;;  %v589_v0 = vld [vmem:[#allocation7 + $0x30] sm:$0xff] }
 0x183   :  { %v330_v7 = vmax.f32 %v987_v4, 0.0  ;;  %v972_v2 = vpack.c.bf16 %v590_v1, %v589_v0  ;;  %v592_v4 = vld [vmem:[#allocation7 + $0x48] sm:$0xff] }
 0x184   :  { %970 = vmatpush3.bf16.msra.mxu0 %v969_v63  ;;  %v975_v5 = vpack.c.bf16 %v592_v4, %v591_v3 }
 0x185   :  { %467 = vmatprep.mubr.f32.mxu1 %v330_v7  ;;  %971 = vmatprep.subr.bf16.mxu0 %v1104_v54  ;;  %v594_v7 = vld [vmem:[#allocation7 + $0x58] sm:$0xff] }
 0x186   :  { %468 = vmatmul.mubr.f32.vlgmr.msra.gmra.mrb[0].mxu1 %v329_v9  ;;  %v397_v9 = vsub.s32 1, %v1206_v57 }
 0x187   :  { %933 = vmatpush3.bf16.msra.mxu1 %v932_v8  ;;  %v978_v8 = vpack.c.bf16 %v594_v7, %v593_v6 }
 0x188   :  { %935 = vmatprep.subr.bf16.mxu1 %v934_v10  ;;  %973 = vmatpush3.bf16.msra.mxu0 %v972_v2  ;;  %v398_v10 = vrot.slane %v1212_v59, %v397_v9  ;;  %v402_v11 = vrot.slane %v1217_v60, %v397_v9  ;;  %v510_v60 = vsub.s32 2, %v1206_v57 }
 0x189   :  { %974 = vmatprep.subr.bf16.mxu0 %v1104_v54 }
 0x18a   :  { %v511_v25 = vrot.slane %v1212_v59, %v510_v60 }
 0x18b   :  { %937 = vmatpush3.bf16.msra.mxu1 %v936_v15 }
 0x18c   :  { %939 = vmatprep.subr.bf16.mxu1 %v938_v16  ;;  %976 = vmatpush3.bf16.msra.mxu0 %v975_v5 }
 0x18d   :  { %977 = vmatprep.subr.bf16.mxu0 %v1104_v54 }
 0x18f   :  { %941 = vmatpush3.bf16.msra.mxu1 %v940_v21  ;;  %v597_v21 = vld [vmem:[#allocation7 + $0x70] sm:$0xff] }
 0x190   :  { %943 = vmatprep.subr.bf16.mxu1 %v942_v22  ;;  %979 = vmatpush3.bf16.msra.mxu0 %v978_v8  ;;  %v598_v22 = vld [vmem:[#allocation7 + $0x78] sm:$0xff] }
 0x191   :  { %980 = vmatprep.subr.bf16.mxu0 %v1104_v54  ;;  %v984_v23 = vpack.c.bf16 %v598_v22, %v597_v21 }
 0x193   :  { %945 = vmatpush3.bf16.msra.mxu1 %v944_v27 }
 0x194   :  { %947 = vmatprep.subr.bf16.mxu1 %v946_v28  ;;  %982 = vmatpush3.bf16.msra.mxu0 %v981_v20 }
 0x195   :  { %983 = vmatprep.subr.bf16.mxu0 %v1104_v54 }
 0x197   :  { %949 = vmatpush3.bf16.msra.mxu1 %v948_v33 }
 0x198   :  { %951 = vmatprep.subr.bf16.mxu1 %v950_v34  ;;  %985 = vmatpush3.bf16.msra.mxu0 %v984_v23 }
 0x19b   :  { %953 = vmatpush3.bf16.msra.mxu1 %v952_v39 }
 0x19c   :  { %955 = vmatprep.subr.bf16.mxu1 %v954_v40 }
 0x19f   :  { %957 = vmatpush3.bf16.msra.mxu1 %v956_v43 }
 0x1a0   :  { %959 = vmatprep.subr.bf16.mxu1 %v958_v47 }
 0x1a3   :  { %961 = vmatpush3.bf16.msra.mxu1 %v960_v50 }
 0x259   :  { %v469_v12 = vpop.f32.mrb[0].mxu1 }
 0x25a   :  { %v470_v13 = vadd.f32 %v469_v12, %v398_v10  ;;  %v471_v14 = vpop.f32.mrb[1].mxu1 }
 0x25b   :  { %v472_v15 = vadd.f32 %v471_v14, %v402_v11 }
 0x25c   :  { %v474_v17 = vmax.f32 %v470_v13, 0.0 }
 0x25d   :  { %v475_v16 = vmax.f32 %v472_v15, 0.0 }
 0x25f   :  { %576 = vmatprep.mubr.f32.mxu1 %v475_v16 }
 0x260   :  { %577 = vmatmul.mubr.f32.vlgmr.msra.gmra.mrb[2].mxu1 %v474_v17 }
 0x333   :  { %v715_v24 = vpop.f32.mrb[2].mxu1 }
 0x334   :  { %v716_v26 = vpop.f32.mrb[3].mxu1 }
 0x335   :  { %v717_v27 = vadd.f32 %v716_v26, %v715_v24 }
 0x337   :  { %v579_v28 = vadd.f32 %v717_v27, %v511_v25 }
 0x339   :  { %v582_v29 = vmax.f32 %v579_v28, 0.0 }
 0x33b   :  { %768 = vmatmul.mubr.f32.vlgmr.msra.gmra.mrb[2].mxu0 %v582_v29 }
 0x40e   :  { %v669_v32 = vpop.f32.mrb[2].mxu0 }
 0x40f   :  { %v670_v33 = vadd.f32 %v669_v32, %v602_v31  ;;  %v769_v34 = vpop.f32.mrb[3].mxu0 }
 0x411   :  { %v673_v35 = vmax.f32 %v670_v33, 0.0 }
 0x413   :  { %v674_v36 = vadd.f32 0.0001, %v673_v35 }
 0x415   :  { %675 = vst [vmem:[%s1238_s6] sm:$0xff] %v674_v36 }
 0x416   :  { %680 = vsyncpa [#allocation3], 1 }
 0x417   :  { %681 = vsyncpa [#allocation5], 1 }
 0x418   :  { %682 = vsyncpa [#allocation8], 1 }

</bundles_post_ra>
